<compile_context>
chip_gen: v5e
topology: v5e:2x2
jax: 0.10.0
libtpu: 0.0.40
codegen_flags: <defaults>
</compile_context>

<pallas_src>
import functools
import math

import jax
import jax.numpy as jnp
from jax.experimental import pallas as pl
from jax.experimental.pallas import tpu as pltpu


# --------------------------------------------------------------------------
# Kernel 1: one-shot K/V projection (hoisted out of the flash loop).
#   k_out = keys   @ (Wk.T * 1/sqrt(E))   (scale folded into the weight)
#   v_out = values @  Wv.T
# --------------------------------------------------------------------------
def _kv_projection_kernel(k_ref, v_ref, wk_ref, wv_ref, kout_ref, vout_ref):
    kout_ref[0] = jnp.dot(k_ref[0], wk_ref[...],
                          preferred_element_type=jnp.float32).astype(kout_ref.dtype)
    vout_ref[0] = jnp.dot(v_ref[0], wv_ref[...],
                          preferred_element_type=jnp.float32).astype(vout_ref.dtype)


def _project_kv(keys, values, wk_scaled_t, wv_t, *, tile, compute_dtype):
    N, L, E = keys.shape
    grid = (N, L // tile)
    return pl.pallas_call(
        _kv_projection_kernel,
        out_shape=(jax.ShapeDtypeStruct((N, L, E), compute_dtype),
                   jax.ShapeDtypeStruct((N, L, E), compute_dtype)),
        grid_spec=pltpu.PrefetchScalarGridSpec(
            num_scalar_prefetch=0,
            grid=grid,
            in_specs=[
                pl.BlockSpec((1, tile, E), lambda n, i: (n, i, 0)),   # keys
                pl.BlockSpec((1, tile, E), lambda n, i: (n, i, 0)),   # values
                pl.BlockSpec((E, E), lambda n, i: (0, 0)),            # Wk^T*scale (resident)
                pl.BlockSpec((E, E), lambda n, i: (0, 0)),            # Wv^T (resident)
            ],
            out_specs=[
                pl.BlockSpec((1, tile, E), lambda n, i: (n, i, 0)),
                pl.BlockSpec((1, tile, E), lambda n, i: (n, i, 0)),
            ],
        ),
        compiler_params=pltpu.CompilerParams(
            dimension_semantics=("parallel", "parallel")),
    )(keys, values, wk_scaled_t, wv_t)


# --------------------------------------------------------------------------
# Kernel 2: flash-attention over pre-projected K/V + fused output projection.
# --------------------------------------------------------------------------
def _flash_attention_kernel(tk, approx_recip,
                            q_ref, k_ref, v_ref, bias_ref, wo_ref, bo_ref,
                            out_ref,
                            m_sc, l_sc, acc_sc):
    ki = pl.program_id(2)

    @pl.when(ki == 0)
    def _():
        m_sc[...] = jnp.full_like(m_sc, -jnp.inf)
        l_sc[...] = jnp.zeros_like(l_sc)
        acc_sc[...] = jnp.zeros_like(acc_sc)

    q = q_ref[0]          # (tq, E)  raw query (projection is dead in reference)
    k = k_ref[0]          # (tk, E)  pre-projected, already scaled by 1/sqrt(E)
    v = v_ref[0]          # (tk, E)  pre-projected

    # Resident per-batch additive mask bias; slice the live key window.
    start = pl.multiple_of(ki * tk, tk)
    bias = bias_ref[0, :, pl.ds(start, tk)]                                  # (1, tk)

    # energy tile = Q @ K^T via dot_general contracting last dims
    # (feeds the MXU directly, no XLU transpose pass).
    s = jax.lax.dot_general(q, k, (((1,), (1,)), ((), ())),
                            preferred_element_type=jnp.float32)              # (tq, tk)
    s = s + bias                                                             # mask add

    # Online (flash) softmax update; all vector math in f32.
    m_prev = m_sc[...]
    m_new = jnp.maximum(m_prev, jnp.max(s, axis=-1, keepdims=True))
    alpha = jnp.exp(m_prev - m_new)
    p = jnp.exp(s - m_new)
    l_sc[...] = alpha * l_sc[...] + jnp.sum(p, axis=-1, keepdims=True)
    acc_sc[...] = alpha * acc_sc[...] + jnp.dot(
        p.astype(v.dtype), v, preferred_element_type=jnp.float32)
    m_sc[...] = m_new

    @pl.when(ki == pl.num_programs(2) - 1)
    def _():
        inv_l = pl.reciprocal(l_sc[...], approx=approx_recip)
        ctx = (acc_sc[...] * inv_l).astype(wo_ref.dtype)                     # (tq, E)
        out = jnp.dot(ctx, wo_ref[...], preferred_element_type=jnp.float32)
        out_ref[0] = (out + bo_ref[...]).astype(out_ref.dtype)


def self_attention(values, keys, query, mask, params, *, embed_size, heads,
                   tq=256, tk=256, compute_dtype=jnp.bfloat16, out_dtype=None):
    head_dim = embed_size // heads
    assert head_dim * heads == embed_size, "Embed size must be divisible by heads"
    # The reference PyTorch forward only type-checks when head_dim == embed_size.
    assert head_dim == embed_size, "reference forward only runs with heads == 1"

    N, L, E = query.shape
    tq = min(tq, L)
    tk = min(tk, L)
    assert L % tq == 0 and L % tk == 0, "sequence length must divide the tile sizes"

    if out_dtype is None:
        out_dtype = query.dtype
    approx_recip = jnp.dtype(compute_dtype) == jnp.dtype(jnp.bfloat16)

    # One-time layout plumbing in the wrapper: pre-transpose weights to (in, out),
    # fold the 1/sqrt(E) softmax scale into the K weight, cast MXU operands.
    scale = 1.0 / math.sqrt(float(embed_size))
    wk_scaled_t = (params["wk"].T * scale).astype(compute_dtype)
    wv_t = params["wv"].T.astype(compute_dtype)
    wo_t = params["wo"].T.astype(compute_dtype)
    bo = params["bo"].reshape(1, E).astype(jnp.float32)
    # params["wq"] is a dead parameter in the reference forward (unused).

    q_c = query.astype(compute_dtype)
    k_c = keys.astype(compute_dtype)
    v_c = values.astype(compute_dtype)

    # Mask -> resident additive bias (N, 1, L) in f32.
    bias = jnp.where(mask == 0, jnp.float32(-1e20), jnp.float32(0.0))
    bias = bias.astype(jnp.float32)

    # ---- Stage 1: project K/V once (hoisted out of the flash loop). ----
    k_proj, v_proj = _project_kv(k_c, v_c, wk_scaled_t, wv_t,
                                 tile=tk, compute_dtype=compute_dtype)

    # ---- Stage 2: flash attention + fused output projection. ----
    kernel = functools.partial(_flash_attention_kernel, tk, approx_recip)
    grid = (N, L // tq, L // tk)
    return pl.pallas_call(
        kernel,
        out_shape=jax.ShapeDtypeStruct((N, L, E), out_dtype),
        grid_spec=pltpu.PrefetchScalarGridSpec(
            num_scalar_prefetch=0,
            grid=grid,
            in_specs=[
                pl.BlockSpec((1, tq, E), lambda n, qi, ki: (n, qi, 0)),   # query (raw)
                pl.BlockSpec((1, tk, E), lambda n, qi, ki: (n, ki, 0)),   # K_proj (scaled)
                pl.BlockSpec((1, tk, E), lambda n, qi, ki: (n, ki, 0)),   # V_proj
                pl.BlockSpec((1, 1, L), lambda n, qi, ki: (n, 0, 0)),     # mask bias (resident per batch)
                pl.BlockSpec((E, E), lambda n, qi, ki: (0, 0)),           # Wo^T (fc_out, resident)
                pl.BlockSpec((1, E), lambda n, qi, ki: (0, 0)),           # fc_out bias
            ],
            out_specs=pl.BlockSpec((1, tq, E), lambda n, qi, ki: (n, qi, 0)),
            scratch_shapes=[
                pltpu.VMEM((tq, 1), jnp.float32),   # running row max
                pltpu.VMEM((tq, 1), jnp.float32),   # running softmax denominator
                pltpu.VMEM((tq, E), jnp.float32),   # output accumulator
            ],
        ),
        compiler_params=pltpu.CompilerParams(
            dimension_semantics=("parallel", "parallel", "arbitrary")),
    )(q_c, k_proj, v_proj, bias, wo_t, bo)


def reference_jax(values, keys, query, mask, params, *, embed_size):
    """Plain-JAX mirror of the PyTorch forward (heads == 1)."""
    V = values @ params["wv"].T
    K = keys @ params["wk"].T
    energy = jnp.einsum("nqd,nkd->nqk", query, K)
    energy = jnp.where(mask == 0, -1e20, energy)          # mask (N,1,L) broadcasts
    attn = jax.nn.softmax(energy / jnp.sqrt(jnp.float32(embed_size)), axis=-1)
    out = jnp.einsum("nqk,nkd->nqd", attn, V)
    return out @ params["wo"].T + params["bo"]


if __name__ == "__main__":
    N, L = 2, 256          # batch, sequence length (value_len == key_len == query_len)
    embed_size, heads = 128, 1
    head_dim = embed_size // heads

    key = jax.random.PRNGKey(0)
    kv, kk, kq, km, k1, k2, k3, k4, k5 = jax.random.split(key, 9)

    values = jax.random.normal(kv, (N, L, embed_size), dtype=jnp.float32)
    keys_in = jax.random.normal(kk, (N, L, embed_size), dtype=jnp.float32)
    query = jax.random.normal(kq, (N, L, embed_size), dtype=jnp.float32)
    # Mask: mostly ones with a few zeros, shape (N, 1, L)  (torch: (N,1,1,L)).
    mask = (jax.random.uniform(km, (N, 1, L)) > 0.2).astype(jnp.int32)

    def linear_init(k, out_f, in_f):
        bound = 1.0 / jnp.sqrt(jnp.float32(in_f))
        return jax.random.uniform(k, (out_f, in_f), minval=-bound, maxval=bound,
                                  dtype=jnp.float32)

    params = {
        "wv": linear_init(k1, head_dim, head_dim),
        "wk": linear_init(k2, head_dim, head_dim),
        "wq": linear_init(k3, head_dim, head_dim),   # present but dead in forward
        "wo": linear_init(k4, embed_size, heads * head_dim),
        "bo": jax.random.uniform(k5, (embed_size,),
                                 minval=-1.0 / jnp.sqrt(jnp.float32(embed_size)),
                                 maxval=1.0 / jnp.sqrt(jnp.float32(embed_size)),
                                 dtype=jnp.float32),
    }

    ref = reference_jax(values, keys_in, query, mask, params, embed_size=embed_size)

    # Performance path: bf16 MXU operands, f32 accumulation (relaxed tolerance).
    out_bf16 = self_attention(values, keys_in, query, mask, params,
                              embed_size=embed_size, heads=heads,
                              compute_dtype=jnp.bfloat16)
    out_bf16 = jax.block_until_ready(out_bf16)
    assert out_bf16.shape == (N, L, embed_size)
    assert jnp.allclose(out_bf16, ref, rtol=5e-2, atol=5e-2), \
        "bf16 kernel mismatch vs. JAX reference"

    # f32 compute path for tight numerical parity with the reference.
    out_f32 = self_attention(values, keys_in, query, mask, params,
                             embed_size=embed_size, heads=heads,
                             compute_dtype=jnp.float32)
    out_f32 = jax.block_until_ready(out_f32)
    assert jnp.allclose(out_f32, ref, rtol=1e-4, atol=1e-4), \
        "f32 kernel mismatch vs. JAX reference"

    print("KERNEL_OK")
</pallas_src>

<mosaic_0001>
module attributes {stable_mosaic.version = 11 : i64} {
  func.func @_kv_projection_kernel(%arg0: i32, %arg1: i32, %arg2: memref<1x256x128xbf16, #tpu.memory_space<vmem>>, %arg3: memref<1x256x128xbf16, #tpu.memory_space<vmem>>, %arg4: memref<128x128xbf16, #tpu.memory_space<vmem>>, %arg5: memref<128x128xbf16, #tpu.memory_space<vmem>>, %arg6: memref<1x256x128xbf16, #tpu.memory_space<vmem>>, %arg7: memref<1x256x128xbf16, #tpu.memory_space<vmem>>) attributes {dimension_semantics = [#tpu.dimension_semantics<parallel>, #tpu.dimension_semantics<parallel>], iteration_bounds = array<i64: 2, 1>, scalar_prefetch = 0 : i64, scratch_operands = 0 : i64, tpu.core_type = #tpu.core_type<tc>, window_params = [{transform_indices = @transform_0, window_bounds = array<i64: 1, 256, 128>}, {transform_indices = @transform_1, window_bounds = array<i64: 1, 256, 128>}, {pipeline_mode = #tpu.pipeline_mode<synchronous>, transform_indices = @transform_2, window_bounds = array<i64: 128, 128>}, {pipeline_mode = #tpu.pipeline_mode<synchronous>, transform_indices = @transform_3, window_bounds = array<i64: 128, 128>}, {transform_indices = @transform_4, window_bounds = array<i64: 1, 256, 128>}, {transform_indices = @transform_5, window_bounds = array<i64: 1, 256, 128>}]} {
    %c0 = arith.constant 0 : index
    %c0_0 = arith.constant 0 : index
    %c0_1 = arith.constant 0 : index
    %0 = vector.load %arg2[%c0, %c0_0, %c0_1] : memref<1x256x128xbf16, #tpu.memory_space<vmem>>, vector<1x256x128xbf16>
    %1 = vector.shape_cast %0 : vector<1x256x128xbf16> to vector<256x128xbf16>
    %c0_2 = arith.constant 0 : index
    %c0_3 = arith.constant 0 : index
    %2 = vector.load %arg4[%c0_2, %c0_3] : memref<128x128xbf16, #tpu.memory_space<vmem>>, vector<128x128xbf16>
    %cst = arith.constant dense<0.000000e+00> : vector<256x128xf32>
    %3 = tpu.matmul %1, %2, %cst {dimension_numbers = #tpu.dot_dimension_numbers<[1], [0], [0], [1], [0, 0, 1, 1], [], []>} : vector<256x128xbf16>, vector<128x128xbf16>, vector<256x128xf32> -> vector<256x128xf32>
    %4 = arith.truncf %3 : vector<256x128xf32> to vector<256x128xbf16>
    %c0_4 = arith.constant 0 : index
    %c0_5 = arith.constant 0 : index
    %c0_6 = arith.constant 0 : index
    %5 = vector.load %arg6[%c0_4, %c0_5, %c0_6] : memref<1x256x128xbf16, #tpu.memory_space<vmem>>, vector<1x256x128xbf16>
    %6 = vector.shape_cast %5 : vector<1x256x128xbf16> to vector<256x128xbf16>
    %7 = vector.shape_cast %4 : vector<256x128xbf16> to vector<1x256x128xbf16>
    tpu.vector_store %arg6[%c0_4, %c0_5, %c0_6], %7 {strides = array<i32>} : memref<1x256x128xbf16, #tpu.memory_space<vmem>>, vector<1x256x128xbf16>,
    %c0_7 = arith.constant 0 : index
    %c0_8 = arith.constant 0 : index
    %c0_9 = arith.constant 0 : index
    %8 = vector.load %arg3[%c0_7, %c0_8, %c0_9] : memref<1x256x128xbf16, #tpu.memory_space<vmem>>, vector<1x256x128xbf16>
    %9 = vector.shape_cast %8 : vector<1x256x128xbf16> to vector<256x128xbf16>
    %c0_10 = arith.constant 0 : index
    %c0_11 = arith.constant 0 : index
    %10 = vector.load %arg5[%c0_10, %c0_11] : memref<128x128xbf16, #tpu.memory_space<vmem>>, vector<128x128xbf16>
    %cst_12 = arith.constant dense<0.000000e+00> : vector<256x128xf32>
    %11 = tpu.matmul %9, %10, %cst_12 {dimension_numbers = #tpu.dot_dimension_numbers<[1], [0], [0], [1], [0, 0, 1, 1], [], []>} : vector<256x128xbf16>, vector<128x128xbf16>, vector<256x128xf32> -> vector<256x128xf32>
    %12 = arith.truncf %11 : vector<256x128xf32> to vector<256x128xbf16>
    %c0_13 = arith.constant 0 : index
    %c0_14 = arith.constant 0 : index
    %c0_15 = arith.constant 0 : index
    %13 = vector.load %arg7[%c0_13, %c0_14, %c0_15] : memref<1x256x128xbf16, #tpu.memory_space<vmem>>, vector<1x256x128xbf16>
    %14 = vector.shape_cast %13 : vector<1x256x128xbf16> to vector<256x128xbf16>
    %15 = vector.shape_cast %12 : vector<256x128xbf16> to vector<1x256x128xbf16>
    tpu.vector_store %arg7[%c0_13, %c0_14, %c0_15], %15 {strides = array<i32>} : memref<1x256x128xbf16, #tpu.memory_space<vmem>>, vector<1x256x128xbf16>,
    return
  }
  func.func @transform_0(%arg0: i32, %arg1: i32) -> (i32, i32, i32) {
    %c0_i32 = arith.constant 0 : i32
    %c0_i32_0 = arith.constant 0 : i32
    return %arg0, %arg1, %c0_i32 : i32, i32, i32
  }
  func.func @transform_1(%arg0: i32, %arg1: i32) -> (i32, i32, i32) {
    %c0_i32 = arith.constant 0 : i32
    %c0_i32_0 = arith.constant 0 : i32
    return %arg0, %arg1, %c0_i32 : i32, i32, i32
  }
  func.func @transform_2(%arg0: i32, %arg1: i32) -> (i32, i32) {
    %c0_i32 = arith.constant 0 : i32
    %c0_i32_0 = arith.constant 0 : i32
    %c0_i32_1 = arith.constant 0 : i32
    return %c0_i32, %c0_i32_0 : i32, i32
  }
  func.func @transform_3(%arg0: i32, %arg1: i32) -> (i32, i32) {
    %c0_i32 = arith.constant 0 : i32
    %c0_i32_0 = arith.constant 0 : i32
    %c0_i32_1 = arith.constant 0 : i32
    return %c0_i32, %c0_i32_0 : i32, i32
  }
  func.func @transform_4(%arg0: i32, %arg1: i32) -> (i32, i32, i32) {
    %c0_i32 = arith.constant 0 : i32
    %c0_i32_0 = arith.constant 0 : i32
    return %arg0, %arg1, %c0_i32 : i32, i32, i32
  }
  func.func @transform_5(%arg0: i32, %arg1: i32) -> (i32, i32, i32) {
    %c0_i32 = arith.constant 0 : i32
    %c0_i32_0 = arith.constant 0 : i32
    return %arg0, %arg1, %c0_i32 : i32, i32, i32
  }
}

</mosaic_0001>

<bundles_post_ra>
// kernel: tpu_custom_call.1
= control target key start
LH: loop header
LB: loop body
LE: loop exit
PB: predicated region body
PF: predicated region fallthrough
CT: control target
= control target key end

     0   :  { %s2396_s0 = inlined_call_operand.hbm [shape: bf16[2,256,128], index: 0, kind: input, shape index: {}]   ;;  %s2397_s1 = inlined_call_operand.hbm [shape: bf16[2,256,128], index: 1, kind: input, shape index: {}]   ;;  %s2398_s2 = inlined_call_operand.hbm [shape: bf16[128,128], index: 2, kind: input, shape index: {}]   ;;  %s2399_s3 = inlined_call_operand.hbm [shape: bf16[128,128], index: 3, kind: input, shape index: {}]   ;;  %s2400_s4 = inlined_call_operand.hbm [shape: bf16[2,256,128], index: 4, kind: output, shape index: {0}]   ;;  %s2401_s5 = inlined_call_operand.hbm [shape: bf16[2,256,128], index: 5, kind: output, shape index: {1}]  }
   0x1   :  { %2409 = sst [smem:[#allocation23_spill]] %s2398_s2 }
   0x2   :  { %2410 = sst [smem:[#allocation24_spill]] %s2399_s3 }
   0x3   :  { %11 = vsyncpa [#allocation3], 0 }
   0x4   :  { %13 = vsyncpa [#allocation3 + $0x1], 0 }
   0x5   :  { %14 = vsyncpa [#allocation6], 0 }
   0x6   :  { %16 = vsyncpa [#allocation6 + $0x1], 0 }
   0x7   :  { %17 = vsyncpa [#allocation9], 0 }
   0x8   :  { %18 = vsyncpa [#allocation4], 0 }
   0x9   :  { %20 = vsyncpa [#allocation4 + $0x1], 0 }
   0xa   :  { %21 = vsyncpa [#allocation12], 0 }
   0xb   :  { %23 = vsyncpa [#allocation12 + $0x1], 0  ;;  %s2117_s18 = smov 0   ;;  %s2119_s19 = smov 0  }
   0xc   :  { %s2121_s20 = smov 0   ;;  %s2123_s21 = smov 0  }
   0xd   :  { %s2125_s22 = smov 0   ;;  %s2127_s23 = smov 0  }
   0xe LB: > { %2411 = sst [smem:[#allocation19_spill]] %s2067_s20  ;;  %s2148_s24 = sadd.s32 4294967295, %s2079_s23   ;;  %s2079_s23 = sphi %s2127_s23, %s29_s23   ;;  %s2075_s22 = sphi %s2125_s22, %s2427_s22   ;;  %s2071_s21 = sphi %s2123_s21, %s2426_s21   ;;  %s2067_s20 = sphi %s2121_s20, %s2425_s20   ;;  %s2063_s19 = sphi %s2119_s19, %s2429_s19   ;;  %s2059_s18 = sphi %s2117_s18, %s2428_s18  }
   0xf   : > { %2412 = sst [smem:[#allocation20_spill]] %s2075_s22  ;;  %s1260_s25 = sadd.s32 4294967294, %s2079_s23  }
  0x10   : > { %p63_p0 = scmp.ne.s32.totalorder %s2063_s19, %s2059_s18  ;;  %p64_p1 = scmp.eq.s32.totalorder %s2148_s24, 0 }
  0x11   : > { %p159_p2 = scmp.eq.s32.totalorder %s2148_s24, 1  ;;  %p165_p3 = scmp.eq.s32.totalorder %s1260_s25, 1 }
  0x12   : > { %p2157_p4 = por %p64_p1, %p63_p0  ;;  %p1261_p5 = scmp.ge.s32.totalorder %s2079_s23, 1 }
  0x13   : > { %p2162_p6 = por %p165_p3, %p63_p0  ;;  %p200_p7 = scmp.lt.s32.totalorder %s2079_s23, 3 }
  0x14   : > { %s2415_s2 = sld [smem:[#allocation23_spill]]  ;;  %s2081_s7 = smov [#allocation7]  }
  0x15   : > { %p2170_p8 = pnand %p1261_p5, %p200_p7  ;;  %s213_s8 = sshll.u32 %s2081_s7, 4  ;;  %s214_s8 = int_to_ptr.vmem [resolvable:$true] %s213_s8 }
  0x16   : > { %p1264_p11 = scmp.ge.s32.totalorder %s2079_s23, 2  ;;  %s2417_s3 = sld [smem:[#allocation24_spill]] }
  0x17   : > { %p1752_p9 = pneg %p2170_p8  ;;  %s2402_s12 = smov 64  }
  0x18   : > { %s2404_s13 = smov 4   ;;  %s2084_s14 = smov [#allocation8]  }
  0x19   : > { %p1753_p10 = pnand %p1752_p9, %p64_p1  ;;  %s227_s15 = sshll.u32 %s2084_s14, 4  ;;  %s228_s15 = int_to_ptr.vmem [resolvable:$true] %s227_s15 }
  0x1a   : > { %s211_s30 = sshll.u32 %s2415_s2, 4  ;;  %s41_s16 = sadd.s32 1, %s2075_s22  ;;  %s212_s30 = int_to_ptr.hbm [resolvable:$true] %s211_s30 }
  0x1b   : > { %1755 = dma.hbm_to_vmem [thread:$0]  (!%p1753_p10), %s212_s30, 1024, %s214_s8, [#allocation6], %s2402_s12, %s2402_s12, %s2404_s13  }
  0x1c   : > { %s225_s11 = sshll.u32 %s2417_s3, 4  ;;  %s50_s17 = sadd.s32 1, %s2067_s20  ;;  %s226_s11 = int_to_ptr.hbm [resolvable:$true] %s225_s11 }
  0x1d   : > { %1758 = dma.hbm_to_vmem [thread:$0]  (!%p1753_p10), %s226_s11, 1024, %s228_s15, [#allocation9], %s2402_s12, %s2402_s12, %s2404_s13  }
  0x1e   : > { %p43_p12 = scmp.ge.s32.totalorder %s41_s16, 2  ;;  %p57_p13 = scmp.ne.s32.totalorder %s2067_s20, %s2063_s19 }
  0x1f   : > { %p58_p0 = scmp.eq.s32.totalorder %s2079_s23, 0  ;;  %p1775_p3 = scmp.lt.s32.totalorder %s2079_s23, 2 }
  0x20   : > { %s2431_s16 = smov (%p43_p12, %s41_s16), 0  ;;  %p2202_p7 = por %p159_p2, %p57_p13 }
  0x21   : > { %2418 = sst [smem:[#allocation21_spill]] %s2431_s16  ;;  %p2196_p5 = por %p58_p0, %p57_p13 }
  0x22   : > { %s45_s29 = ssub.s32 %s2075_s22, %s2431_s16  ;;  %s241_s30 = sand.u32 1, %s2067_s20  }
  0x23   : > { %p48_p9 = scmp.eq.s32.totalorder %s45_s29, 0  ;;  %s1265_s7 = sshll.u32 %s241_s30, 7 }
  0x24   : > { %s1478_s8 = sshll.u32 %s2075_s22, 7  ;;  %s245_s12 = scalar_lea.vmem [#allocation2], %s1265_s7 }
  0x25   : > { %s2211_s9 = scalar_select %p48_p9, %s2067_s20, %s50_s17  }
  0x26   : > { %s252_s14 = scalar_lea.hbm %s2396_s0, %s1478_s8  ;;  %s255_s13 = sshll.u32 %s245_s12, 4  ;;  %s256_s13 = int_to_ptr.vmem [resolvable:$true] %s255_s13 }
  0x27   : > { %2421 = sst [smem:[#allocation22_spill]] %s2211_s9  ;;  %s253_s15 = sshll.u32 %s252_s14, 4  ;;  %s254_s15 = int_to_ptr.hbm [resolvable:$true] %s253_s15 }
  0x28   : > { %p1760_p2 = pnand %p1775_p3, %p2196_p5  ;;  %s276_s29 = scalar_lea.hbm %s2397_s1, %s1478_s8 }
  0x29   : > { %s269_s16 = scalar_lea.vmem [#allocation5], %s1265_s7  ;;  %s277_s22 = sshll.u32 %s276_s29, 4  ;;  %s278_s22 = int_to_ptr.hbm [resolvable:$true] %s277_s22 }
  0x2a   : > { %s279_s17 = sshll.u32 %s269_s16, 4  ;;  %s242_s9 = scalar_lea.sflag [#allocation3], %s241_s30  ;;  %s280_s17 = int_to_ptr.vmem [resolvable:$true] %s279_s17 }
  0x2b   : > { %s2422_s20 = smov 4   ;;  %s2423_s10 = smov 64  }
  0x2c   : > { %1762 = dma.hbm_to_vmem [thread:$0]  (!%p1760_p2), %s254_s15, 2048, %s256_s13, %s242_s9, %s2423_s10, %s2423_s10, %s2422_s20  }
  0x2d   : > { %s265_s12 = sand.u32 1, %s2079_s23   ;;  %291 = sbr.rel (%p2170_p8) target bundleno = 361 (0x169), region = 36 }
  0x2e   : > { %s266_s11 = scalar_lea.sflag [#allocation6], %s265_s12  ;;  %s2233_s2 = sand.u32 (!%p2170_p8), 1, %s2063_s19  }
  0x2f   : > { %1765 = dma.hbm_to_vmem [thread:$0]  (!%p1760_p2), %s278_s22, 2048, %s280_s17, %s266_s11, %s2423_s10, %s2423_s10, %s2422_s20  }
  0x30   : > { %s2236_s3 = sshll.u32 (!%p2170_p8), %s2233_s2, 7  ;;  %s294_s13 = scalar_lea.sflag (!%p2170_p8), [#allocation3], %s2233_s2 }
  0x31   : > { %s2240_s16 = scalar_lea.vmem (!%p2170_p8), [#allocation2], %s2236_s3 }
  0x32   : > { %2034 = dma.done.wait (%p2157_p4), %s294_s13, 2048  }
  0x33   : > { %2036 = vsyncadd (%p2157_p4), %s294_s13, 4294965248  ;;  %s303_s20 = sand.u32 1, %s2148_s24   ;;  %s2248_s6 = scalar_lea.vmem [#allocation5], %s2236_s3 }
  0x34   : > { %s304_s22 = scalar_lea.sflag [#allocation6], %s303_s20 }
  0x35   : > { %2038 = dma.done.wait (%p2157_p4), %s304_s22, 2048  }
  0x36   : > { %2040 = vsyncadd (%p2157_p4), %s304_s22, 4294965248 }
  0x37   : > { %2042 = dma.done.wait (%p64_p1), [#allocation6], 1024  }
  0x38   : > { %2044 = vsyncadd (%p64_p1), [#allocation6], 4294966272 }
  0x39   : > { %2046 = dma.done.wait (%p64_p1), [#allocation9], 1024  }
  0x3a   : > { %2048 = vsyncadd (%p64_p1), [#allocation9], 4294966272  ;;  %v1503_v0 = vld [vmem:[#allocation7 + $0x38] sm:$0xff]  ;;  %v1502_v2 = vld [vmem:[#allocation7 + $0x30] sm:$0xff]  ;;  %s2295_s24 = scalar_lea.vmem [#allocation10], %s2236_s3  ;;  %s2299_s26 = scalar_lea.vmem [#allocation11], %s2236_s3 }
  0x3b   : > { %v1527_v1 = vld [vmem:[#allocation8 + $0x38] sm:$0xff]  ;;  %551 = vmatpush.bf16.msra.mxu0 %v1503_v0  ;;  %1720 = vmatpush.bf16.msra.mxu2 %v1503_v0  ;;  %v1526_v3 = vld [vmem:[#allocation8 + $0x30] sm:$0xff]  ;;  %v1501_v4 = vld [vmem:[#allocation7 + $0x28] sm:$0xff]  ;;  %s1528_s25 = sshll.u32 %s2071_s21, 7  ;;  %s1069_s9 = sshll.u32 %s2295_s24, 4  ;;  %s2338_s9 = int_to_ptr.vmem [resolvable:$true] %s1069_s9 }
  0x3c   : > { %896 = vmatpush.bf16.msra.mxu1 %v1527_v1  ;;  %1728 = vmatpush.bf16.msra.mxu3 %v1527_v1  ;;  %v1525_v5 = vld [vmem:[#allocation8 + $0x28] sm:$0xff]  ;;  %v1500_v6 = vld [vmem:[#allocation7 + $0x20] sm:$0xff]  ;;  %v1499_v8 = vld [vmem:[#allocation7 + $0x18] sm:$0xff]  ;;  %s1068_s8 = scalar_lea.hbm %s2400_s4, %s1528_s25  ;;  %s1087_s29 = scalar_lea.hbm %s2401_s5, %s1528_s25 }
  0x3d   : > { %v1524_v7 = vld [vmem:[#allocation8 + $0x20] sm:$0xff]  ;;  %v1523_v9 = vld [vmem:[#allocation8 + $0x18] sm:$0xff]  ;;  %v1498_v10 = vld [vmem:[#allocation7 + $0x10] sm:$0xff]  ;;  %s1071_s21 = sshll.u32 %s1068_s8, 4  ;;  %s1088_s17 = sshll.u32 %s2299_s26, 4  ;;  %s1072_s21 = int_to_ptr.hbm [resolvable:$true] %s1071_s21  ;;  %s2342_s17 = int_to_ptr.vmem [resolvable:$true] %s1088_s17 }
  0x3e   : > { %v1522_v11 = vld [vmem:[#allocation8 + $0x10] sm:$0xff]  ;;  %v1497_v12 = vld [vmem:[#allocation7 + $0x8] sm:$0xff]  ;;  %v1496_v14 = vld [vmem:[#allocation7] sm:$0xff]  ;;  %s1090_s10 = sshll.u32 %s1087_s29, 4  ;;  %s1050_s12 = scalar_lea.sflag [#allocation4], %s2233_s2  ;;  %s2344_s10 = int_to_ptr.hbm [resolvable:$true] %s1090_s10 }
  0x3f   : > { %552 = vmatpush.bf16.msra.mxu0 %v1502_v2  ;;  %1721 = vmatpush.bf16.msra.mxu2 %v1502_v2  ;;  %v1521_v13 = vld [vmem:[#allocation8 + $0x8] sm:$0xff]  ;;  %v1520_v15 = vld [vmem:[#allocation8] sm:$0xff]  ;;  %v1482_v24 = vld [vmem:[%s2240_s16 + $0x10] sm:$0xff]  ;;  %s1967_s11 = sshra.s32 %s1072_s21, 4  ;;  %s1973_s20 = scalar_lea.hbm %s2400_s4, 256  ;;  %s1968_s11 = int_to_ptr.hbm [resolvable:$true] %s1967_s11 }
  0x40   : > { %897 = vmatpush.bf16.msra.mxu1 %v1526_v3  ;;  %1729 = vmatpush.bf16.msra.mxu3 %v1526_v3  ;;  %v1480_v16 = vld [vmem:[%s2240_s16] sm:$0xff]  ;;  %v1481_v20 = vld [vmem:[%s2240_s16 + $0x8] sm:$0xff]  ;;  %v1490_v25 = vld [vmem:[%s2240_s16 + $0x50] sm:$0xff]  ;;  %s1969_s3 = scalar_lea.hbm %s1968_s11, 128  ;;  %p1974_p10 = scmp.lt.s32.totalorder %s1968_s11, %s2400_s4 }
  0x41   : > { %v1488_v17 = vld [vmem:[%s2240_s16 + $0x40] sm:$0xff]  ;;  %v1489_v21 = vld [vmem:[%s2240_s16 + $0x48] sm:$0xff]  ;;  %v1506_v26 = vld [vmem:[%s2248_s6 + $0x10] sm:$0xff]  ;;  %p1970_p1 = scmp.ne.s32.totalorder %s1968_s11, %s1969_s3  ;;  %p1975_p12 = scmp.lt.s32.totalorder %s1973_s20, %s1969_s3 }
  0x42   : > { %v1504_v18 = vld [vmem:[%s2248_s6] sm:$0xff]  ;;  %v1505_v22 = vld [vmem:[%s2248_s6 + $0x8] sm:$0xff]  ;;  %v1514_v27 = vld [vmem:[%s2248_s6 + $0x50] sm:$0xff] }
  0x43   : > { %553 = vmatpush.bf16.msra.mxu0 %v1501_v4  ;;  %1722 = vmatpush.bf16.msra.mxu2 %v1501_v4  ;;  %v1512_v19 = vld [vmem:[%s2248_s6 + $0x40] sm:$0xff]  ;;  %v1513_v23 = vld [vmem:[%s2248_s6 + $0x48] sm:$0xff]  ;;  %v1483_v28 = vld [vmem:[%s2240_s16 + $0x18] sm:$0xff]  ;;  %p1971_p4 = pnand %p1970_p1, %p2202_p7  ;;  %p1976_p13 = por %p1975_p12, %p1974_p10 }
  0x44   : > { %898 = vmatpush.bf16.msra.mxu1 %v1525_v5  ;;  %1730 = vmatpush.bf16.msra.mxu3 %v1525_v5  ;;  %v1491_v29 = vld [vmem:[%s2240_s16 + $0x58] sm:$0xff]  ;;  %v1484_v32 = vld [vmem:[%s2240_s16 + $0x20] sm:$0xff]  ;;  %v1485_v36 = vld [vmem:[%s2240_s16 + $0x28] sm:$0xff] }
  0x45   : > { %v1507_v30 = vld [vmem:[%s2248_s6 + $0x18] sm:$0xff]  ;;  %v1492_v33 = vld [vmem:[%s2240_s16 + $0x60] sm:$0xff]  ;;  %v1493_v37 = vld [vmem:[%s2240_s16 + $0x68] sm:$0xff]  ;;  %p1972_p8 = pneg %p1971_p4 }
  0x46   : > { %v1515_v31 = vld [vmem:[%s2248_s6 + $0x58] sm:$0xff]  ;;  %v1508_v34 = vld [vmem:[%s2248_s6 + $0x20] sm:$0xff]  ;;  %v1509_v38 = vld [vmem:[%s2248_s6 + $0x28] sm:$0xff] }
  0x47   : > { %554 = vmatpush.bf16.msra.mxu0 %v1500_v6  ;;  %1723 = vmatpush.bf16.msra.mxu2 %v1500_v6  ;;  %v1516_v35 = vld [vmem:[%s2248_s6 + $0x60] sm:$0xff]  ;;  %v1517_v39 = vld [vmem:[%s2248_s6 + $0x68] sm:$0xff]  ;;  %v1486_v40 = vld [vmem:[%s2240_s16 + $0x30] sm:$0xff]  ;;  %p1977_p0 = pnand %p1976_p13, %p1972_p8 }
  0x48   : > { %899 = vmatpush.bf16.msra.mxu1 %v1524_v7  ;;  %1731 = vmatpush.bf16.msra.mxu3 %v1524_v7  ;;  %v1494_v41 = vld [vmem:[%s2240_s16 + $0x70] sm:$0xff]  ;;  %v1487_v44 = vld [vmem:[%s2240_s16 + $0x38] sm:$0xff] }
  0x49   : > { %v1510_v42 = vld [vmem:[%s2248_s6 + $0x30] sm:$0xff]  ;;  %v1495_v45 = vld [vmem:[%s2240_s16 + $0x78] sm:$0xff] }
  0x4a   : > { %v1518_v43 = vld [vmem:[%s2248_s6 + $0x70] sm:$0xff]  ;;  %v1511_v46 = vld [vmem:[%s2248_s6 + $0x38] sm:$0xff] }
  0x4b   : > { %555 = vmatpush.bf16.msra.mxu0 %v1499_v8  ;;  %1724 = vmatpush.bf16.msra.mxu2 %v1499_v8  ;;  %v1519_v47 = vld [vmem:[%s2248_s6 + $0x78] sm:$0xff] }
  0x4c   : > { %900 = vmatpush.bf16.msra.mxu1 %v1523_v9  ;;  %1732 = vmatpush.bf16.msra.mxu3 %v1523_v9 }
  0x4f   : > { %556 = vmatpush.bf16.msra.mxu0 %v1498_v10  ;;  %1725 = vmatpush.bf16.msra.mxu2 %v1498_v10 }
  0x50   : > { %901 = vmatpush.bf16.msra.mxu1 %v1522_v11  ;;  %1733 = vmatpush.bf16.msra.mxu3 %v1522_v11 }
  0x53   : > { %557 = vmatpush.bf16.msra.mxu0 %v1497_v12  ;;  %1726 = vmatpush.bf16.msra.mxu2 %v1497_v12 }
  0x54   : > { %902 = vmatpush.bf16.msra.mxu1 %v1521_v13  ;;  %1734 = vmatpush.bf16.msra.mxu3 %v1521_v13 }
  0x57   : > { %558 = vmatpush.bf16.msra.mxu0 %v1496_v14  ;;  %1727 = vmatpush.bf16.msra.mxu2 %v1496_v14 }
  0x58   : > { %903 = vmatpush.bf16.msra.mxu1 %v1520_v15  ;;  %1735 = vmatpush.bf16.msra.mxu3 %v1520_v15 }
  0x5a   : > { %559 = vmatmul.bf16.vlgmr.msra.gmra.mxu0 %v1480_v16  ;;  %599 = vmatmul.bf16.vlgmr.msra.gmra.mxu2 %v1488_v17 }
  0x5b   : > { %904 = vmatmul.bf16.vlgmr.msra.gmra.mxu1 %v1504_v18  ;;  %944 = vmatmul.bf16.vlgmr.msra.gmra.mxu3 %v1512_v19 }
  0x6a   : > { %564 = vmatmul.bf16.gmra.mxu0 %v1481_v20  ;;  %604 = vmatmul.bf16.gmra.mxu2 %v1489_v21 }
  0x6b   : > { %909 = vmatmul.bf16.gmra.mxu1 %v1505_v22  ;;  %949 = vmatmul.bf16.gmra.mxu3 %v1513_v23 }
  0x7a   : > { %569 = vmatmul.bf16.gmra.mxu0 %v1482_v24  ;;  %609 = vmatmul.bf16.gmra.mxu2 %v1490_v25 }
  0x7b   : > { %914 = vmatmul.bf16.gmra.mxu1 %v1506_v26  ;;  %954 = vmatmul.bf16.gmra.mxu3 %v1514_v27 }
  0x8a   : > { %574 = vmatmul.bf16.gmra.mxu0 %v1483_v28  ;;  %614 = vmatmul.bf16.gmra.mxu2 %v1491_v29 }
  0x8b   : > { %919 = vmatmul.bf16.gmra.mxu1 %v1507_v30  ;;  %959 = vmatmul.bf16.gmra.mxu3 %v1515_v31 }
  0x9a   : > { %579 = vmatmul.bf16.gmra.mxu0 %v1484_v32  ;;  %619 = vmatmul.bf16.gmra.mxu2 %v1492_v33 }
  0x9b   : > { %924 = vmatmul.bf16.gmra.mxu1 %v1508_v34  ;;  %964 = vmatmul.bf16.gmra.mxu3 %v1516_v35 }
  0xaa   : > { %584 = vmatmul.bf16.gmra.mxu0 %v1485_v36  ;;  %624 = vmatmul.bf16.gmra.mxu2 %v1493_v37 }
  0xab   : > { %929 = vmatmul.bf16.gmra.mxu1 %v1509_v38  ;;  %969 = vmatmul.bf16.gmra.mxu3 %v1517_v39 }
  0xba   : > { %589 = vmatmul.bf16.gmra.mxu0 %v1486_v40  ;;  %629 = vmatmul.bf16.gmra.mxu2 %v1494_v41 }
  0xbb   : > { %934 = vmatmul.bf16.gmra.mxu1 %v1510_v42  ;;  %974 = vmatmul.bf16.gmra.mxu3 %v1518_v43 }
  0xca   : > { %594 = vmatmul.bf16.gmra.mxu0 %v1487_v44  ;;  %634 = vmatmul.bf16.gmra.mxu2 %v1495_v45 }
  0xcb   : > { %939 = vmatmul.bf16.gmra.mxu1 %v1511_v46  ;;  %979 = vmatmul.bf16.gmra.mxu3 %v1519_v47 }
  0xd7   : > { %v560_v48 = vpop.f32.mrf.mxu0 }
  0xd8   : > { %v905_v49 = vpop.f32.mrf.mxu1 }
  0xdd   : > { %v600_v50 = vpop.f32.mrf.mxu2 }
  0xde   : > { %v945_v51 = vpop.f32.mrf.mxu3 }
  0xdf   : > { %v562_v52 = vpop.f32.mrf.mxu0 }
  0xe0   : > { %v1533_v53 = vpack.c.bf16 %v562_v52, %v560_v48  ;;  %v907_v54 = vpop.f32.mrf.mxu1 }
  0xe1   : > { %v1613_v55 = vpack.c.bf16 %v907_v54, %v905_v49 }
  0xe2   : > { %1534 = vst [vmem:[%s2295_s24] sm:$0xff] %v1533_v53  }
  0xe3   : > { %1614 = vst [vmem:[%s2299_s26] sm:$0xff] %v1613_v55  }
  0xe5   : > { %v602_v56 = vpop.f32.mrf.mxu2 }
  0xe6   : > { %v1573_v57 = vpack.c.bf16 %v602_v56, %v600_v50  ;;  %v947_v58 = vpop.f32.mrf.mxu3 }
  0xe7   : > { %v1653_v59 = vpack.c.bf16 %v947_v58, %v945_v51  ;;  %v565_v60 = vpop.f32.mrf.mxu0 }
  0xe8   : > { %1697 = vst [vmem:[%s2295_s24 + $0x40] sm:$0xff] %v1573_v57   ;;  %v910_v61 = vpop.f32.mrf.mxu1 }
  0xe9   : > { %1712 = vst [vmem:[%s2299_s26 + $0x40] sm:$0xff] %v1653_v59  }
  0xed   : > { %v605_v62 = vpop.f32.mrf.mxu2 }
  0xee   : > { %v950_v63 = vpop.f32.mrf.mxu3 }
  0xef   : > { %v567_v0 = vpop.f32.mrf.mxu0 }
  0xf0   : > { %v1538_v1 = vpack.c.bf16 %v567_v0, %v565_v60  ;;  %v912_v2 = vpop.f32.mrf.mxu1 }
  0xf1   : > { %v1618_v3 = vpack.c.bf16 %v912_v2, %v910_v61 }
  0xf2   : > { %1690 = vst [vmem:[%s2295_s24 + $0x8] sm:$0xff] %v1538_v1  }
  0xf3   : > { %1705 = vst [vmem:[%s2299_s26 + $0x8] sm:$0xff] %v1618_v3  }
  0xf5   : > { %v607_v4 = vpop.f32.mrf.mxu2 }
  0xf6   : > { %v1578_v5 = vpack.c.bf16 %v607_v4, %v605_v62  ;;  %v952_v6 = vpop.f32.mrf.mxu3 }
  0xf7   : > { %v1658_v7 = vpack.c.bf16 %v952_v6, %v950_v63  ;;  %v570_v8 = vpop.f32.mrf.mxu0 }
  0xf8   : > { %1698 = vst [vmem:[%s2295_s24 + $0x48] sm:$0xff] %v1578_v5   ;;  %v915_v9 = vpop.f32.mrf.mxu1 }
  0xf9   : > { %1713 = vst [vmem:[%s2299_s26 + $0x48] sm:$0xff] %v1658_v7  }
  0xfd   : > { %v610_v10 = vpop.f32.mrf.mxu2 }
  0xfe   : > { %v955_v11 = vpop.f32.mrf.mxu3 }
  0xff   : > { %v572_v12 = vpop.f32.mrf.mxu0 }
 0x100   : > { %v1543_v13 = vpack.c.bf16 %v572_v12, %v570_v8  ;;  %v917_v14 = vpop.f32.mrf.mxu1 }
 0x101   : > { %v1623_v15 = vpack.c.bf16 %v917_v14, %v915_v9 }
 0x102   : > { %1691 = vst [vmem:[%s2295_s24 + $0x10] sm:$0xff] %v1543_v13  }
 0x103   : > { %1706 = vst [vmem:[%s2299_s26 + $0x10] sm:$0xff] %v1623_v15  }
 0x105   : > { %v612_v16 = vpop.f32.mrf.mxu2 }
 0x106   : > { %v1583_v17 = vpack.c.bf16 %v612_v16, %v610_v10  ;;  %v957_v18 = vpop.f32.mrf.mxu3 }
 0x107   : > { %v1663_v19 = vpack.c.bf16 %v957_v18, %v955_v11  ;;  %v575_v20 = vpop.f32.mrf.mxu0 }
 0x108   : > { %1699 = vst [vmem:[%s2295_s24 + $0x50] sm:$0xff] %v1583_v17   ;;  %v920_v21 = vpop.f32.mrf.mxu1 }
 0x109   : > { %1714 = vst [vmem:[%s2299_s26 + $0x50] sm:$0xff] %v1663_v19  }
 0x10d   : > { %v615_v22 = vpop.f32.mrf.mxu2 }
 0x10e   : > { %v960_v23 = vpop.f32.mrf.mxu3 }
 0x10f   : > { %v577_v24 = vpop.f32.mrf.mxu0 }
 0x110   : > { %v1548_v25 = vpack.c.bf16 %v577_v24, %v575_v20  ;;  %v922_v26 = vpop.f32.mrf.mxu1 }
 0x111   : > { %v1628_v27 = vpack.c.bf16 %v922_v26, %v920_v21 }
 0x112   : > { %1692 = vst [vmem:[%s2295_s24 + $0x18] sm:$0xff] %v1548_v25  }
 0x113   : > { %1707 = vst [vmem:[%s2299_s26 + $0x18] sm:$0xff] %v1628_v27  }
 0x115   : > { %v617_v28 = vpop.f32.mrf.mxu2 }
 0x116   : > { %v1588_v29 = vpack.c.bf16 %v617_v28, %v615_v22  ;;  %v962_v30 = vpop.f32.mrf.mxu3 }
 0x117   : > { %v1668_v31 = vpack.c.bf16 %v962_v30, %v960_v23  ;;  %v580_v32 = vpop.f32.mrf.mxu0 }
 0x118   : > { %1700 = vst [vmem:[%s2295_s24 + $0x58] sm:$0xff] %v1588_v29   ;;  %v925_v33 = vpop.f32.mrf.mxu1 }
 0x119   : > { %1715 = vst [vmem:[%s2299_s26 + $0x58] sm:$0xff] %v1668_v31  }
 0x11d   : > { %v620_v34 = vpop.f32.mrf.mxu2 }
 0x11e   : > { %v965_v35 = vpop.f32.mrf.mxu3 }
 0x11f   : > { %v582_v36 = vpop.f32.mrf.mxu0 }
 0x120   : > { %v1553_v37 = vpack.c.bf16 %v582_v36, %v580_v32  ;;  %v927_v38 = vpop.f32.mrf.mxu1 }
 0x121   : > { %v1633_v39 = vpack.c.bf16 %v927_v38, %v925_v33 }
 0x122   : > { %1693 = vst [vmem:[%s2295_s24 + $0x20] sm:$0xff] %v1553_v37  }
 0x123   : > { %1708 = vst [vmem:[%s2299_s26 + $0x20] sm:$0xff] %v1633_v39  }
 0x125   : > { %v622_v40 = vpop.f32.mrf.mxu2 }
 0x126   : > { %v1593_v41 = vpack.c.bf16 %v622_v40, %v620_v34  ;;  %v967_v42 = vpop.f32.mrf.mxu3 }
 0x127   : > { %v1673_v43 = vpack.c.bf16 %v967_v42, %v965_v35  ;;  %v585_v44 = vpop.f32.mrf.mxu0 }
 0x128   : > { %1701 = vst [vmem:[%s2295_s24 + $0x60] sm:$0xff] %v1593_v41   ;;  %v930_v45 = vpop.f32.mrf.mxu1 }
 0x129   : > { %1716 = vst [vmem:[%s2299_s26 + $0x60] sm:$0xff] %v1673_v43  }
 0x12d   : > { %v625_v46 = vpop.f32.mrf.mxu2 }
 0x12e   : > { %v970_v47 = vpop.f32.mrf.mxu3 }
 0x12f   : > { %v587_v48 = vpop.f32.mrf.mxu0 }
 0x130   : > { %v1558_v49 = vpack.c.bf16 %v587_v48, %v585_v44  ;;  %v932_v50 = vpop.f32.mrf.mxu1 }
 0x131   : > { %v1638_v51 = vpack.c.bf16 %v932_v50, %v930_v45 }
 0x132   : > { %1694 = vst [vmem:[%s2295_s24 + $0x28] sm:$0xff] %v1558_v49  }
 0x133   : > { %1709 = vst [vmem:[%s2299_s26 + $0x28] sm:$0xff] %v1638_v51  }
 0x135   : > { %v627_v52 = vpop.f32.mrf.mxu2 }
 0x136   : > { %v1598_v53 = vpack.c.bf16 %v627_v52, %v625_v46  ;;  %v972_v54 = vpop.f32.mrf.mxu3 }
 0x137   : > { %v1678_v55 = vpack.c.bf16 %v972_v54, %v970_v47  ;;  %v590_v56 = vpop.f32.mrf.mxu0 }
 0x138   : > { %1702 = vst [vmem:[%s2295_s24 + $0x68] sm:$0xff] %v1598_v53   ;;  %v935_v57 = vpop.f32.mrf.mxu1 }
 0x139   : > { %1717 = vst [vmem:[%s2299_s26 + $0x68] sm:$0xff] %v1678_v55  }
 0x13d   : > { %v630_v58 = vpop.f32.mrf.mxu2 }
 0x13e   : > { %v975_v59 = vpop.f32.mrf.mxu3 }
 0x13f   : > { %v592_v60 = vpop.f32.mrf.mxu0 }
 0x140   : > { %v1563_v61 = vpack.c.bf16 %v592_v60, %v590_v56  ;;  %v937_v62 = vpop.f32.mrf.mxu1 }
 0x141   : > { %v1643_v63 = vpack.c.bf16 %v937_v62, %v935_v57 }
 0x142   : > { %1695 = vst [vmem:[%s2295_s24 + $0x30] sm:$0xff] %v1563_v61  }
 0x143   : > { %1710 = vst [vmem:[%s2299_s26 + $0x30] sm:$0xff] %v1643_v63  }
 0x145   : > { %v632_v0 = vpop.f32.mrf.mxu2 }
 0x146   : > { %v1603_v1 = vpack.c.bf16 %v632_v0, %v630_v58  ;;  %v977_v2 = vpop.f32.mrf.mxu3 }
 0x147   : > { %v1683_v3 = vpack.c.bf16 %v977_v2, %v975_v59  ;;  %v595_v4 = vpop.f32.mrf.mxu0 }
 0x148   : > { %1703 = vst [vmem:[%s2295_s24 + $0x70] sm:$0xff] %v1603_v1   ;;  %v940_v5 = vpop.f32.mrf.mxu1 }
 0x149   : > { %1718 = vst [vmem:[%s2299_s26 + $0x70] sm:$0xff] %v1683_v3  }
 0x14d   : > { %v635_v6 = vpop.f32.mrf.mxu2 }
 0x14e   : > { %v980_v7 = vpop.f32.mrf.mxu3 }
 0x14f   : > { %v597_v8 = vpop.f32.mrf.mxu0 }
 0x150   : > { %v1568_v9 = vpack.c.bf16 %v597_v8, %v595_v4  ;;  %v942_v10 = vpop.f32.mrf.mxu1 }
 0x151   : > { %v1648_v11 = vpack.c.bf16 %v942_v10, %v940_v5 }
 0x152   : > { %1696 = vst [vmem:[%s2295_s24 + $0x38] sm:$0xff] %v1568_v9  }
 0x153   : > { %1711 = vst [vmem:[%s2299_s26 + $0x38] sm:$0xff] %v1648_v11  }
 0x155   : > { %v637_v12 = vpop.f32.mrf.mxu2 }
 0x156   : > { %v1608_v13 = vpack.c.bf16 %v637_v12, %v635_v6  ;;  %v982_v14 = vpop.f32.mrf.mxu3 }
 0x157   : > { %v1688_v15 = vpack.c.bf16 %v982_v14, %v980_v7 }
 0x158   : > { %1704 = vst [vmem:[%s2295_s24 + $0x78] sm:$0xff] %v1608_v13  }
 0x159   : > { %1719 = vst [vmem:[%s2299_s26 + $0x78] sm:$0xff] %v1688_v15  }
 0x15a   : > { %1980 = shalt.err (!%p1977_p0)
}
 0x15b   : > { %s2085_s24 = smov 64   ;;  %s2086_s26 = smov 4  }
 0x15c   : > { %1748 = dma.vmem_to_hbm [thread:$0]  (%p2202_p7), %s2338_s9, 2048, %s1072_s21, %s1050_s12, %s2085_s24, %s2085_s24, %s2086_s26  }
 0x15d   : > { %s1055_s25 = scalar_lea.sflag [#allocation12], %s2233_s2  ;;  %s1995_s30 = sshra.s32 %s2344_s10, 4  ;;  %s1996_s30 = int_to_ptr.hbm [resolvable:$true] %s1995_s30 }
 0x15e   : > { %s1997_s7 = scalar_lea.hbm %s1996_s30, 128  ;;  %s2001_s15 = scalar_lea.hbm %s2401_s5, 256 }
 0x15f   : > { %p1998_p3 = scmp.ne.s32.totalorder %s1996_s30, %s1997_s7  ;;  %p2002_p2 = scmp.lt.s32.totalorder %s1996_s30, %s2401_s5 }
 0x160   : > { %p2003_p1 = scmp.lt.s32.totalorder %s2001_s15, %s1997_s7 }
 0x161   : > { %p1999_p5 = pnand %p1998_p3, %p2202_p7 }
 0x162   : > { %p2004_p4 = por %p2003_p1, %p2002_p2 }
 0x163   : > { %p2000_p9 = pneg %p1999_p5 }
 0x165   : > { %p2005_p8 = pnand %p2004_p4, %p2000_p9 }
 0x167   : > { %2008 = shalt.err (!%p2005_p8)
}
 0x168   : > { %1749 = dma.vmem_to_hbm [thread:$0]  (%p2202_p7), %s2342_s17, 2048, %s2344_s10, %s1055_s25, %s2085_s24, %s2085_s24, %s2086_s26  }
 0x169 PF: > { %s1105_s2 = sand.u32 1, %s2059_s18   ;;  %p1767_p10 = pnand %p1264_p11, %p2162_p6 }
 0x16a   : > { %s1106_s9 = scalar_lea.sflag [#allocation4], %s1105_s2 }
 0x16b   : > { %p1768_p12 = pneg %p1767_p10 }
 0x16d   : > { %2050 = dma.done.wait (%p1768_p12), %s1106_s9, 2048  }
 0x16e   : > { %2052 = vsyncadd (%p1768_p12), %s1106_s9, 4294965248  ;;  %s1116_s21 = scalar_lea.sflag [#allocation12], %s1105_s2 }
 0x16f   : > { %2054 = dma.done.wait (%p1768_p12), %s1116_s21, 2048  }
 0x170   : > { %2056 = vsyncadd (%p1768_p12), %s1116_s21, 4294965248  ;;  %s29_s23 = sadd.s32 1, %s2079_s23   ;;  %s2424_s28 = sld [smem:[#allocation19_spill]] }
 0x171   : > { %p26_p13 = scmp.ge.s32.totalorder %s29_s23, 4   ;;  %s2425_s20 = sld [smem:[#allocation22_spill]] }
 0x172   : > { %s2426_s21 = sld [smem:[#allocation20_spill]]  ;;  %s2428_s18 = smov %s2063_s19 }
 0x173   : > { %s2427_s22 = sld [smem:[#allocation21_spill]]  ;;  %28 = sbr.rel (!%p26_p13) target bundleno = 14 (0xe), region = 119 }
 0x176   : > { %s2429_s19 = smov %s2424_s28 }
 0x178   :  { %1122 = vsyncpa [#allocation3], 1 }
 0x179   :  { %1124 = vsyncpa [#allocation3 + $0x1], 1 }
 0x17a   :  { %1125 = vsyncpa [#allocation6], 1 }
 0x17b   :  { %1127 = vsyncpa [#allocation6 + $0x1], 1 }
 0x17c   :  { %1128 = vsyncpa [#allocation9], 1 }
 0x17d   :  { %1129 = vsyncpa [#allocation4], 1 }
 0x17e   :  { %1131 = vsyncpa [#allocation4 + $0x1], 1 }
 0x17f   :  { %1132 = vsyncpa [#allocation12], 1 }
 0x180   :  { %1134 = vsyncpa [#allocation12 + $0x1], 1 }

</bundles_post_ra>
